<compile_context>
chip_gen: v6e
topology: v6e:2x2x1
jax: 0.10.0
libtpu: 0.0.40
codegen_flags: <defaults>
</compile_context>

<pallas_src>
import jax
import jax.numpy as jnp
from jax.experimental import pallas as pl
from jax.experimental.pallas import tpu as pltpu

BN_EPS = 0.001  # BN_epsilon()


def _pointwise_kernel(w_ref, b_ref, x_ref, o_ref):
    # w_ref: (Cout, Cin)       BN-scale-folded 1x1 conv weight
    # b_ref: (Cout, 1)         folded conv-bias + BN shift
    # x_ref: (nb, Cin, t_hw)   channels on sublanes, spatial on lanes
    # o_ref: (nb, Cout, t_hw)
    w = w_ref[...]
    b = b_ref[...]
    for i in range(x_ref.shape[0]):            # nb is a small static constant
        acc = jnp.dot(w, x_ref[i], preferred_element_type=jnp.float32)
        o_ref[i] = jnp.maximum(acc + b, 0.0).astype(o_ref.dtype)


def _round_up(x, m):
    return ((x + m - 1) // m) * m


def _vmem_budgets():
    """(pipelined-buffer budget, vmem_limit_bytes), generation-aware."""
    try:
        cap = pltpu.get_tpu_info().vmem_capacity_bytes
    except Exception:
        cap = 64 * 1024 * 1024                      # unknown -> be conservative
    if cap >= 100 * 1024 * 1024:                    # v5e / v6e: 128 MiB VMEM
        return 72 * 1024 * 1024, 100 * 1024 * 1024
    return 32 * 1024 * 1024, 48 * 1024 * 1024       # v7x: 64 MiB VMEM


def _pick_tiles(n, cin, cout, hw, budget):
    """Pick (nb, t_hw): batch rows and lane columns processed per grid step."""
    hw128 = _round_up(hw, 128)
    # Weight + bias stay resident; conservatively count them double-buffered.
    w_bytes = 2 * (cin * cout + cout) * 4
    lane_bytes = (cin + cout) * 4                    # one x col + one out col, f32
    avail = budget - w_bytes
    if avail < 2 * lane_bytes * 128:
        # TODO(synk): very large Cin*Cout would need a Cin grid axis with an
        # f32 accumulator (init/finalize via pl.when); Tiny_MagicNet channel
        # counts never get close to this, so guard explicitly instead.
        raise NotImplementedError(
            "PointwiseConv weight too large for resident-weight kernel")
    # Largest lane tile the double-buffered x/out tiles allow.
    max_lanes = ((avail // (2 * lane_bytes)) // 128) * 128
    # Byte-targeted lane tile: ~4 MiB of combined x+out per grid step keeps
    # the ~0.35us/step overhead negligible while staying near the HBM roofline.
    tgt_lanes = ((4 * 1024 * 1024) // lane_bytes // 128) * 128
    tgt_lanes = min(max(tgt_lanes, 128), 32 * 1024)
    t_hw = max(128, min(hw128, max_lanes, tgt_lanes))
    # v7x megacore: with a single image, keep >=2 'parallel' spatial steps so
    # both TensorCores get work (harmless on single-TC v5e/v6e).
    if n == 1 and hw128 >= 256:
        t_hw = min(t_hw, _round_up(pl.cdiv(hw, 2), 128))
    spatial_tiles = pl.cdiv(hw, t_hw)
    # Small images (whole spatial extent in one tile): block several batch
    # elements per step to amortize per-step overhead, while keeping >=2
    # parallel steps when possible.
    nb = 1
    if spatial_tiles == 1 and n > 1:
        step_bytes = lane_bytes * t_hw
        want = max(1, (2 * 1024 * 1024) // step_bytes)
        nb_vmem = max(1, avail // (2 * step_bytes))
        nb_max = max(1, min(n, want, nb_vmem))
        for cand in range(nb_max, 0, -1):
            if n % cand == 0 and (n // cand) * spatial_tiles >= min(2, n):
                nb = cand
                break
    return nb, t_hw


@jax.jit
def pointwise_conv(x_nchw, conv_w, conv_b, gamma, beta, run_mean, run_var):
    """1x1 conv + BatchNorm(eval) + relu, matching PyTorch PointwiseConv.forward.

    x_nchw : (N, Cin, H, W) float32
    conv_w : (Cout, Cin, 1, 1) float32   (PyTorch Conv2d weight layout)
    conv_b : (Cout,) float32
    gamma, beta, run_mean, run_var : (Cout,) float32
    returns (N, Cout, H, W) float32
    """
    N, Cin, H, W = x_nchw.shape
    Cout = conv_w.shape[0]
    HW = H * W

    # Fold BatchNorm (eval mode, running stats) into the 1x1 conv:
    #   y = scale * (W x + b - mean) + beta,  scale = gamma / sqrt(var + eps)
    inv_std = jax.lax.rsqrt(run_var.astype(jnp.float32) + BN_EPS)
    scale = gamma.astype(jnp.float32) * inv_std                       # (Cout,)
    w2d = conv_w.reshape(Cout, Cin).astype(jnp.float32) * scale[:, None]
    bias = ((conv_b.astype(jnp.float32) - run_mean.astype(jnp.float32)) * scale
            + beta.astype(jnp.float32)).reshape(Cout, 1)

    # Channels on sublanes, spatial on lanes; this reshape is free (no copy),
    # and there is NO padding pass and NO output slice pass (ragged last block
    # is handled by the grid / masked output stores).
    x3d = x_nchw.reshape(N, Cin, HW).astype(jnp.float32)
    # TODO(synk): if bf16 activations are acceptable, keeping x3d / the output
    # in bf16 would ~halve HBM traffic; kept f32 to match the PyTorch module.

    budget, vmem_limit = _vmem_budgets()
    nb, t_hw = _pick_tiles(N, Cin, Cout, HW, budget)
    grid = (pl.cdiv(N, nb), pl.cdiv(HW, t_hw))

    cost = pl.CostEstimate(
        flops=2 * N * HW * Cin * Cout,
        transcendentals=0,
        bytes_accessed=4 * (N * HW * (Cin + Cout) + Cin * Cout + Cout),
    )

    out3d = pl.pallas_call(
        _pointwise_kernel,
        out_shape=jax.ShapeDtypeStruct((N, Cout, HW), jnp.float32),
        grid_spec=pltpu.PrefetchScalarGridSpec(
            num_scalar_prefetch=0,
            grid=grid,
            in_specs=[
                pl.BlockSpec((Cout, Cin), lambda n, j: (0, 0)),
                pl.BlockSpec((Cout, 1), lambda n, j: (0, 0)),
                pl.BlockSpec((nb, Cin, t_hw), lambda n, j: (n, 0, j)),
            ],
            out_specs=pl.BlockSpec((nb, Cout, t_hw), lambda n, j: (n, 0, j)),
        ),
        compiler_params=pltpu.CompilerParams(
            dimension_semantics=("parallel", "parallel"),
            vmem_limit_bytes=vmem_limit,
        ),
        cost_estimate=cost,
    )(w2d, bias, x3d)

    return out3d.reshape(N, Cout, H, W)


def _reference(x_nchw, conv_w, conv_b, gamma, beta, run_mean, run_var):
    N, Cin, H, W = x_nchw.shape
    Cout = conv_w.shape[0]
    x2d = jnp.transpose(x_nchw, (0, 2, 3, 1)).reshape(-1, Cin)
    w2d = jnp.transpose(conv_w.reshape(Cout, Cin), (1, 0))
    y = x2d @ w2d + conv_b
    y = (y - run_mean) / jnp.sqrt(run_var + BN_EPS) * gamma + beta
    y = jnp.maximum(y, 0.0)
    return jnp.transpose(y.reshape(N, H, W, Cout), (0, 3, 1, 2))


if __name__ == "__main__":
    key = jax.random.PRNGKey(0)
    k_x, k_w, k_b, k_g, k_be, k_m, k_v = jax.random.split(key, 7)

    N, Cin, Cout, H, W = 2, 4, 8, 16, 16

    x = jax.random.normal(k_x, (N, Cin, H, W), dtype=jnp.float32)
    # Deterministic synthetic parameters (module __init__ shapes).
    conv_w = jax.random.normal(k_w, (Cout, Cin, 1, 1), dtype=jnp.float32) * 0.1
    conv_b = jax.random.normal(k_b, (Cout,), dtype=jnp.float32) * 0.1
    gamma = 1.0 + 0.1 * jax.random.normal(k_g, (Cout,), dtype=jnp.float32)
    beta = 0.1 * jax.random.normal(k_be, (Cout,), dtype=jnp.float32)
    run_mean = 0.1 * jax.random.normal(k_m, (Cout,), dtype=jnp.float32)
    run_var = jnp.abs(jax.random.normal(k_v, (Cout,), dtype=jnp.float32)) + 0.5

    out = pointwise_conv(x, conv_w, conv_b, gamma, beta, run_mean, run_var)
    out = jax.block_until_ready(out)

    ref = _reference(x, conv_w, conv_b, gamma, beta, run_mean, run_var)
    assert out.shape == (N, Cout, H, W)
    assert jnp.allclose(out, ref, atol=1e-4, rtol=1e-4), "mismatch vs reference"

    # TODO(synk): BatchNorm implemented with eval-mode (running-stats) semantics;
    # training-mode batch statistics / momentum update are not reproduced.
    print("KERNEL_OK")
</pallas_src>

<mosaic_0001>
module attributes {stable_mosaic.version = 11 : i64} {
  func.func @_pointwise_kernel(%arg0: i32, %arg1: i32, %arg2: memref<8x4xf32, #tpu.memory_space<vmem>>, %arg3: memref<8x1xf32, #tpu.memory_space<vmem>>, %arg4: memref<1x4x256xf32, #tpu.memory_space<vmem>>, %arg5: memref<1x8x256xf32, #tpu.memory_space<vmem>>) attributes {dimension_semantics = [#tpu.dimension_semantics<parallel>, #tpu.dimension_semantics<parallel>], iteration_bounds = array<i64: 2, 1>, scalar_prefetch = 0 : i64, scratch_operands = 0 : i64, tpu.core_type = #tpu.core_type<tc>, window_params = [{pipeline_mode = #tpu.pipeline_mode<synchronous>, transform_indices = @transform_0, window_bounds = array<i64: 8, 4>}, {pipeline_mode = #tpu.pipeline_mode<synchronous>, transform_indices = @transform_1, window_bounds = array<i64: 8, 1>}, {transform_indices = @transform_2, window_bounds = array<i64: 1, 4, 256>}, {transform_indices = @transform_3, window_bounds = array<i64: 1, 8, 256>}]} {
    %c0 = arith.constant 0 : index
    %c0_0 = arith.constant 0 : index
    %0 = vector.load %arg2[%c0, %c0_0] : memref<8x4xf32, #tpu.memory_space<vmem>>, vector<8x4xf32>
    %c0_1 = arith.constant 0 : index
    %c0_2 = arith.constant 0 : index
    %1 = vector.load %arg3[%c0_1, %c0_2] : memref<8x1xf32, #tpu.memory_space<vmem>>, vector<8x1xf32>
    %c0_3 = arith.constant 0 : index
    %c0_4 = arith.constant 0 : index
    %c0_5 = arith.constant 0 : index
    %2 = vector.load %arg4[%c0_3, %c0_4, %c0_5] : memref<1x4x256xf32, #tpu.memory_space<vmem>>, vector<1x4x256xf32>
    %3 = vector.shape_cast %2 : vector<1x4x256xf32> to vector<4x256xf32>
    %cst = arith.constant dense<0.000000e+00> : vector<8x256xf32>
    %4 = tpu.matmul %0, %3, %cst {dimension_numbers = #tpu.dot_dimension_numbers<[1], [0], [0], [1], [0, 0, 1, 1], [], []>} : vector<8x4xf32>, vector<4x256xf32>, vector<8x256xf32> -> vector<8x256xf32>
    %5 = vector.broadcast %1 : vector<8x1xf32> to vector<8x256xf32>
    %6 = arith.addf %4, %5 : vector<8x256xf32>
    %cst_6 = arith.constant 0.000000e+00 : f32
    %7 = vector.broadcast %cst_6 : f32 to vector<8x256xf32>
    %8 = arith.maximumf %6, %7 : vector<8x256xf32>
    %c0_7 = arith.constant 0 : index
    %c0_8 = arith.constant 0 : index
    %c0_9 = arith.constant 0 : index
    %9 = vector.load %arg5[%c0_7, %c0_8, %c0_9] : memref<1x8x256xf32, #tpu.memory_space<vmem>>, vector<1x8x256xf32>
    %10 = vector.shape_cast %9 : vector<1x8x256xf32> to vector<8x256xf32>
    %11 = vector.shape_cast %8 : vector<8x256xf32> to vector<1x8x256xf32>
    tpu.vector_store %arg5[%c0_7, %c0_8, %c0_9], %11 {strides = array<i32>} : memref<1x8x256xf32, #tpu.memory_space<vmem>>, vector<1x8x256xf32>,
    return
  }
  func.func @transform_0(%arg0: i32, %arg1: i32) -> (i32, i32) {
    %c0_i32 = arith.constant 0 : i32
    %c0_i32_0 = arith.constant 0 : i32
    %c0_i32_1 = arith.constant 0 : i32
    return %c0_i32, %c0_i32_0 : i32, i32
  }
  func.func @transform_1(%arg0: i32, %arg1: i32) -> (i32, i32) {
    %c0_i32 = arith.constant 0 : i32
    %c0_i32_0 = arith.constant 0 : i32
    %c0_i32_1 = arith.constant 0 : i32
    return %c0_i32, %c0_i32_0 : i32, i32
  }
  func.func @transform_2(%arg0: i32, %arg1: i32) -> (i32, i32, i32) {
    %c0_i32 = arith.constant 0 : i32
    %c0_i32_0 = arith.constant 0 : i32
    return %arg0, %c0_i32, %arg1 : i32, i32, i32
  }
  func.func @transform_3(%arg0: i32, %arg1: i32) -> (i32, i32, i32) {
    %c0_i32 = arith.constant 0 : i32
    %c0_i32_0 = arith.constant 0 : i32
    return %arg0, %c0_i32, %arg1 : i32, i32, i32
  }
}

</mosaic_0001>

<bundles_post_ra>
// kernel: pointwise_conv.1
= control target key start
LH: loop header
LB: loop body
LE: loop exit
PB: predicated region body
PF: predicated region fallthrough
CT: control target
= control target key end

     0   :  { %s481_s12 = smov 0   ;;  %s483_s13 = smov 0   ;;  %s520_s0 = inlined_call_operand.vmem [shape: f32[8,4], index: 0, kind: input, shape index: {}]   ;;  %s521_s1 = inlined_call_operand.vmem [shape: f32[8,1], index: 1, kind: input, shape index: {}]   ;;  %s522_s2 = inlined_call_operand.vmem [shape: f32[2,4,256], index: 2, kind: input, shape index: {}]   ;;  %s523_s3 = inlined_call_operand.vmem [shape: f32[2,8,256], index: 3, kind: output, shape index: {}]  }
   0x1   :  { %s485_s14 = smov 0  }
   0x2 LB: > { %s25_s15 = sadd.s32 1, %s453_s13  ;;  %p395_p0 = scmp.ge.s32.totalorder %s457_s14, 1  ;;  %s457_s14 = sphi %s485_s14, %s13_s14   ;;  %s453_s13 = sphi %s483_s13, %s525_s13   ;;  %s449_s12 = sphi %s481_s12, %s524_s12  }
   0x3   : > { %p27_p1 = scmp.ge.s32.totalorder %s25_s15, 2  ;;  %p158_p2 = scmp.lt.s32.totalorder %s457_s14, 3 }
   0x5   : > { %s527_s15 = smov (%p27_p1, %s25_s15), 0  ;;  %p159_p3 = pnand %p395_p0, %p158_p2 }
   0x6   : > { %p191_p4 = scmp.lt.s32.totalorder (!%p159_p3), %s449_s12, 1 }
   0x7   : > { %162 = sbr.rel (%p159_p3) target bundleno = 220 (0xdc), region = 32 }
   0xc   : > { %v459_v0 = vmov 0.0   ;;  %v460_v1 = vmov 0   ;;  %v211_v2 = vld [vmem:[%s521_s1] sm:$0xff]  ;;  %s529_s12 = smov (!%p191_p4, %s449_s12), 1  ;;  %vm224_vm0 = vcmask 1043456   ;;  %vm220_vm1 = vcmask 31744  }
   0xd   : > { %293 = vmatprep.mubr.f32.mxu0 %v459_v0  ;;  %433 = vset.pattern.permute.xlu0 %v460_v1  ;;  %s405_s18 = sshll.u32 %s529_s12, 3  ;;  %v210_v5 = vld [vmem:[%s520_s0] sm:$0xff]  ;;  %s406_s24 = sshll.u32 %s529_s12, 4 }
   0xe   : > { %215 = vperm.xlu0 %433, %v211_v2   ;;  %s198_s21 = scalar_lea.vmem %s522_s2, %s405_s18  ;;  %s208_s27 = scalar_lea.vmem %s523_s3, %s406_s24 }
   0xf   : > { %v212_v3 = vld [vmem:[%s198_s21] sm:$0xff] }
  0x10   : > { %v219_v4 = vcombine.high %v212_v3, %v212_v3 }
  0x12   : > { %400 = vmatprep.subr.msk.mxu0 %vm224_vm0, %v219_v4 }
  0x13   : > { %401 = vmatpush1.msk.msra.mxu0 %vm224_vm0, %v212_v3 }
  0x14   : > { %402 = vmatmul.mubr.msk.f32.vlgmr.msra.gmra.mxu0 %vm220_vm1, %v210_v5 }
  0x89   : > { %v216_v6 = vpop.permute.xlu0 %215 }
  0xd4   : > { %v295_v7 = vpop.f32.mrf.mxu0 }
  0xd5   : > { %v296_v8 = vadd.f32 %v295_v7, %v216_v6 }
  0xd6   : > { %v297_v9 = vpop.f32.mrf.mxu0 }
  0xd7   : > { %v300_v10 = vmax.f32 %v296_v8, 0.0  ;;  %v298_v11 = vadd.f32 %v297_v9, %v216_v6 }
  0xd9   : > { %302 = vst [vmem:[%s208_s27] sm:$0xff] %v300_v10  ;;  %v301_v12 = vmax.f32 %v298_v11, 0.0 }
  0xdb   : > { %303 = vst [vmem:[%s208_s27 + $0x8] sm:$0xff] %v301_v12 }
  0xdc PF: > { %s13_s14 = sadd.s32 1, %s457_s14   ;;  %s524_s12 = smov %s453_s13 }
  0xdd   : > { %p10_p5 = scmp.ge.s32.totalorder %s13_s14, 4   ;;  %s525_s13 = smov %s527_s15 }
  0xdf   :  { %12 = sbr.rel (!%p10_p5) target bundleno = 2 (0x2), region = 62 }

</bundles_post_ra>
